<compile_context>
chip_gen: v7x
topology: tpu7x:2x2x1
jax: 0.10.0
libtpu: 0.0.40
codegen_flags: <defaults>
</compile_context>

<pallas_src>
import jax
import jax.numpy as jnp
from jax.experimental import pallas as pl
from jax.experimental.pallas import tpu as pltpu

BN_EPS = 1e-5
LANE = 128


def _round_up(x, m):
    return (x + m - 1) // m * m


# ---------------------------------------------------------------------------
# Pallas kernels
# ---------------------------------------------------------------------------
def conv_bn_relu_kernel(p_ref, w_ref, s_ref, b_ref, o_ref):
    # p_ref: (tile_m, K) bf16 im2col patch tile, w_ref: (K, Cout_pad) bf16
    # s_ref / b_ref: (1, Cout_pad) f32 folded BN scale/bias
    acc = jnp.dot(p_ref[...], w_ref[...], preferred_element_type=jnp.float32)
    o_ref[...] = jnp.maximum(acc * s_ref[...] + b_ref[...], 0.0).astype(o_ref.dtype)


def avgpool2_kernel(a_ref, b_ref, c_ref, d_ref, o_ref):
    # mean of the four 2x2-window corners, all (tile_r, Wo*C)
    o_ref[...] = ((a_ref[...] + b_ref[...] + c_ref[...] + d_ref[...]) * 0.25
                  ).astype(o_ref.dtype)


# ---------------------------------------------------------------------------
# Glue (im2col, BN folding, layout plumbing)
# ---------------------------------------------------------------------------
def _im2col_3x3(x_pad, hout, wout, stride):
    # x_pad: (N, H+2, W+2, Cin)  ->  (N*hout*wout, 9*Cin), tap order (kh, kw, cin)
    n, _, _, cin = x_pad.shape
    cols = []
    for kh in range(3):
        for kw in range(3):
            sl = jax.lax.slice(
                x_pad,
                (0, kh, kw, 0),
                (n, kh + (hout - 1) * stride + 1, kw + (wout - 1) * stride + 1, cin),
                (1, stride, stride, 1))
            cols.append(sl)  # (n, hout, wout, cin)
    patches = jnp.stack(cols, axis=3)  # (n, hout, wout, 9, cin)
    return patches.reshape(n * hout * wout, 9 * cin)


def conv3x3_bn_relu(x_nhwc, w_oihw, gamma, beta, mean, var, *, stride):
    n, h, w, cin = x_nhwc.shape
    cout = w_oihw.shape[0]
    hout = (h + 2 - 3) // stride + 1
    wout = (w + 2 - 3) // stride + 1

    x_pad = jnp.pad(x_nhwc, ((0, 0), (1, 1), (1, 1), (0, 0)))
    # bf16 patches: halves HBM bytes for the im2col matrix and feeds the MXU
    # at its bf16 peak; accumulation stays f32.
    patches = _im2col_3x3(x_pad, hout, wout, stride).astype(jnp.bfloat16)
    w2d = (jnp.transpose(w_oihw, (2, 3, 1, 0))
           .reshape(9 * cin, cout).astype(jnp.bfloat16))

    inv_std = 1.0 / jnp.sqrt(var + BN_EPS)
    scale = (gamma * inv_std).reshape(1, cout).astype(jnp.float32)
    bias = (beta - mean * gamma * inv_std).reshape(1, cout).astype(jnp.float32)

    m, k = patches.shape
    cout_pad = _round_up(cout, LANE)          # lane-dense output (unmasked vst)
    tile_m = 512 if m >= 512 else _round_up(m, 16)
    m_pad = _round_up(m, tile_m)              # aligned, divisible grid

    patches = jnp.pad(patches, ((0, m_pad - m), (0, 0)))
    w2d = jnp.pad(w2d, ((0, 0), (0, cout_pad - cout)))
    scale = jnp.pad(scale, ((0, 0), (0, cout_pad - cout)))
    bias = jnp.pad(bias, ((0, 0), (0, cout_pad - cout)))

    out = pl.pallas_call(
        conv_bn_relu_kernel,
        out_shape=jax.ShapeDtypeStruct((m_pad, cout_pad), jnp.float32),
        grid=(pl.cdiv(m_pad, tile_m),),
        in_specs=[
            pl.BlockSpec((tile_m, k), lambda i: (i, 0)),
            pl.BlockSpec((k, cout_pad), lambda i: (0, 0)),
            pl.BlockSpec((1, cout_pad), lambda i: (0, 0)),
            pl.BlockSpec((1, cout_pad), lambda i: (0, 0)),
        ],
        out_specs=pl.BlockSpec((tile_m, cout_pad), lambda i: (i, 0)),
        compiler_params=pltpu.CompilerParams(
            dimension_semantics=("parallel",),       # megacore sharding on v7x
            vmem_limit_bytes=32 * 1024 * 1024),      # fits v7x's 64 MiB VMEM
    )(patches, w2d, scale, bias)

    out = out[:m, :cout]                      # strip M / Cout padding
    return out.reshape(n, hout, wout, cout)


def avgpool2(x_nhwc):
    n, h, w, c = x_nhwc.shape
    ho, wo = h // 2, w // 2
    rows, lanes = n * ho, wo * c              # lane-dense 2D view (Wo*C lanes)

    corners = [x_nhwc[:, dh::2, dw::2, :].reshape(rows, lanes)
               for dh in (0, 1) for dw in (0, 1)]

    tile_r = 256 if rows >= 256 else _round_up(rows, 8)
    rows_pad = _round_up(rows, tile_r)
    corners = [jnp.pad(a, ((0, rows_pad - rows), (0, 0))) for a in corners]

    out = pl.pallas_call(
        avgpool2_kernel,
        out_shape=jax.ShapeDtypeStruct((rows_pad, lanes), jnp.float32),
        grid=(pl.cdiv(rows_pad, tile_r),),
        in_specs=[pl.BlockSpec((tile_r, lanes), lambda i: (i, 0))] * 4,
        out_specs=pl.BlockSpec((tile_r, lanes), lambda i: (i, 0)),
        compiler_params=pltpu.CompilerParams(
            dimension_semantics=("parallel",),
            vmem_limit_bytes=32 * 1024 * 1024),
    )(*corners)
    return out[:rows].reshape(n, ho, wo, c)


# ---------------------------------------------------------------------------
# thermal_module forward
# ---------------------------------------------------------------------------
def thermal_module_forward(x_nchw, params):
    x = jnp.transpose(x_nchw, (0, 2, 3, 1))  # NCHW -> NHWC
    x = conv3x3_bn_relu(x, *params["conv1"], stride=2)
    x = conv3x3_bn_relu(x, *params["conv2"], stride=1)
    x = conv3x3_bn_relu(x, *params["conv3"], stride=1)
    x = avgpool2(x)
    return jnp.transpose(x, (0, 3, 1, 2))    # NHWC -> NCHW


def init_params(key, cin=3, width=16):
    # CLIP stem: conv1: cin -> width//2 (stride 2), conv2: width//2 -> width//2,
    # conv3: width//2 -> width.  BN in inference mode (running stats folded).
    w2 = width // 2

    def conv_bn(key, ci, co):
        kw, kg, kb, km, kv = jax.random.split(key, 5)
        weight = 0.1 * jax.random.normal(kw, (co, ci, 3, 3), jnp.float32)
        gamma = 1.0 + 0.1 * jax.random.normal(kg, (co,), jnp.float32)
        beta = 0.05 * jax.random.normal(kb, (co,), jnp.float32)
        mean = 0.05 * jax.random.normal(km, (co,), jnp.float32)
        var = jnp.abs(jax.random.normal(kv, (co,), jnp.float32)) + 0.5
        return (weight, gamma, beta, mean, var)

    k1, k2, k3 = jax.random.split(key, 3)
    return {
        "conv1": conv_bn(k1, cin, w2),
        "conv2": conv_bn(k2, w2, w2),
        "conv3": conv_bn(k3, w2, width),
    }


if __name__ == "__main__":
    key = jax.random.PRNGKey(0)
    kx, kp = jax.random.split(key)

    # small synthetic input, NCHW like PyTorch
    x = jax.random.normal(kx, (2, 3, 16, 16), jnp.float32)
    params = init_params(kp, cin=3, width=16)

    out = jax.jit(thermal_module_forward)(x, params)
    out = jax.block_until_ready(out)

    # conv1 stride-2: 16 -> 8, avgpool 2x2: 8 -> 4, channels = width = 16
    assert out.shape == (2, 16, 4, 4), out.shape
    assert jnp.all(jnp.isfinite(out))
    print("KERNEL_OK")
</pallas_src>

<mosaic_0001>
module attributes {stable_mosaic.version = 11 : i64} {
  func.func @conv_bn_relu_kernel(%arg0: i32, %arg1: memref<128x27xbf16, #tpu.memory_space<vmem>>, %arg2: memref<27x128xbf16, #tpu.memory_space<vmem>>, %arg3: memref<1x128xf32, #tpu.memory_space<vmem>>, %arg4: memref<1x128xf32, #tpu.memory_space<vmem>>, %arg5: memref<128x128xf32, #tpu.memory_space<vmem>>) attributes {dimension_semantics = [#tpu.dimension_semantics<parallel>], iteration_bounds = array<i64: 1>, scalar_prefetch = 0 : i64, scratch_operands = 0 : i64, tpu.core_type = #tpu.core_type<tc>, window_params = [{transform_indices = @transform_0, window_bounds = array<i64: 128, 27>}, {pipeline_mode = #tpu.pipeline_mode<synchronous>, transform_indices = @transform_1, window_bounds = array<i64: 27, 128>}, {pipeline_mode = #tpu.pipeline_mode<synchronous>, transform_indices = @transform_2, window_bounds = array<i64: 1, 128>}, {pipeline_mode = #tpu.pipeline_mode<synchronous>, transform_indices = @transform_3, window_bounds = array<i64: 1, 128>}, {transform_indices = @transform_4, window_bounds = array<i64: 128, 128>}]} {
    %c0 = arith.constant 0 : index
    %c0_0 = arith.constant 0 : index
    %0 = vector.load %arg1[%c0, %c0_0] : memref<128x27xbf16, #tpu.memory_space<vmem>>, vector<128x27xbf16>
    %c0_1 = arith.constant 0 : index
    %c0_2 = arith.constant 0 : index
    %1 = vector.load %arg2[%c0_1, %c0_2] : memref<27x128xbf16, #tpu.memory_space<vmem>>, vector<27x128xbf16>
    %cst = arith.constant dense<0.000000e+00> : vector<128x128xf32>
    %2 = tpu.matmul %0, %1, %cst {dimension_numbers = #tpu.dot_dimension_numbers<[1], [0], [0], [1], [0, 0, 1, 1], [], []>} : vector<128x27xbf16>, vector<27x128xbf16>, vector<128x128xf32> -> vector<128x128xf32>
    %c0_3 = arith.constant 0 : index
    %c0_4 = arith.constant 0 : index
    %3 = vector.load %arg3[%c0_3, %c0_4] : memref<1x128xf32, #tpu.memory_space<vmem>>, vector<1x128xf32>
    %4 = vector.broadcast %3 : vector<1x128xf32> to vector<128x128xf32>
    %5 = arith.mulf %2, %4 : vector<128x128xf32>
    %c0_5 = arith.constant 0 : index
    %c0_6 = arith.constant 0 : index
    %6 = vector.load %arg4[%c0_5, %c0_6] : memref<1x128xf32, #tpu.memory_space<vmem>>, vector<1x128xf32>
    %7 = vector.broadcast %6 : vector<1x128xf32> to vector<128x128xf32>
    %8 = arith.addf %5, %7 : vector<128x128xf32>
    %cst_7 = arith.constant 0.000000e+00 : f32
    %9 = vector.broadcast %cst_7 : f32 to vector<128x128xf32>
    %10 = arith.maximumf %8, %9 : vector<128x128xf32>
    %c0_8 = arith.constant 0 : index
    %c0_9 = arith.constant 0 : index
    %11 = vector.load %arg5[%c0_8, %c0_9] : memref<128x128xf32, #tpu.memory_space<vmem>>, vector<128x128xf32>
    tpu.vector_store %arg5[%c0_8, %c0_9], %10 {strides = array<i32>} : memref<128x128xf32, #tpu.memory_space<vmem>>, vector<128x128xf32>,
    return
  }
  func.func @transform_0(%arg0: i32) -> (i32, i32) {
    %c0_i32 = arith.constant 0 : i32
    %c0_i32_0 = arith.constant 0 : i32
    return %arg0, %c0_i32 : i32, i32
  }
  func.func @transform_1(%arg0: i32) -> (i32, i32) {
    %c0_i32 = arith.constant 0 : i32
    %c0_i32_0 = arith.constant 0 : i32
    %c0_i32_1 = arith.constant 0 : i32
    return %c0_i32, %c0_i32_0 : i32, i32
  }
  func.func @transform_2(%arg0: i32) -> (i32, i32) {
    %c0_i32 = arith.constant 0 : i32
    %c0_i32_0 = arith.constant 0 : i32
    %c0_i32_1 = arith.constant 0 : i32
    return %c0_i32, %c0_i32_0 : i32, i32
  }
  func.func @transform_3(%arg0: i32) -> (i32, i32) {
    %c0_i32 = arith.constant 0 : i32
    %c0_i32_0 = arith.constant 0 : i32
    %c0_i32_1 = arith.constant 0 : i32
    return %c0_i32, %c0_i32_0 : i32, i32
  }
  func.func @transform_4(%arg0: i32) -> (i32, i32) {
    %c0_i32 = arith.constant 0 : i32
    %c0_i32_0 = arith.constant 0 : i32
    return %arg0, %c0_i32 : i32, i32
  }
}

module attributes {stable_mosaic.version = 11 : i64} {
  func.func @conv_bn_relu_kernel(%arg0: i32, %arg1: memref<128x72xbf16, #tpu.memory_space<vmem>>, %arg2: memref<72x128xbf16, #tpu.memory_space<vmem>>, %arg3: memref<1x128xf32, #tpu.memory_space<vmem>>, %arg4: memref<1x128xf32, #tpu.memory_space<vmem>>, %arg5: memref<128x128xf32, #tpu.memory_space<vmem>>) attributes {dimension_semantics = [#tpu.dimension_semantics<parallel>], iteration_bounds = array<i64: 1>, scalar_prefetch = 0 : i64, scratch_operands = 0 : i64, tpu.core_type = #tpu.core_type<tc>, window_params = [{transform_indices = @transform_0, window_bounds = array<i64: 128, 72>}, {pipeline_mode = #tpu.pipeline_mode<synchronous>, transform_indices = @transform_1, window_bounds = array<i64: 72, 128>}, {pipeline_mode = #tpu.pipeline_mode<synchronous>, transform_indices = @transform_2, window_bounds = array<i64: 1, 128>}, {pipeline_mode = #tpu.pipeline_mode<synchronous>, transform_indices = @transform_3, window_bounds = array<i64: 1, 128>}, {transform_indices = @transform_4, window_bounds = array<i64: 128, 128>}]} {
    %c0 = arith.constant 0 : index
    %c0_0 = arith.constant 0 : index
    %0 = vector.load %arg1[%c0, %c0_0] : memref<128x72xbf16, #tpu.memory_space<vmem>>, vector<128x72xbf16>
    %c0_1 = arith.constant 0 : index
    %c0_2 = arith.constant 0 : index
    %1 = vector.load %arg2[%c0_1, %c0_2] : memref<72x128xbf16, #tpu.memory_space<vmem>>, vector<72x128xbf16>
    %cst = arith.constant dense<0.000000e+00> : vector<128x128xf32>
    %2 = tpu.matmul %0, %1, %cst {dimension_numbers = #tpu.dot_dimension_numbers<[1], [0], [0], [1], [0, 0, 1, 1], [], []>} : vector<128x72xbf16>, vector<72x128xbf16>, vector<128x128xf32> -> vector<128x128xf32>
    %c0_3 = arith.constant 0 : index
    %c0_4 = arith.constant 0 : index
    %3 = vector.load %arg3[%c0_3, %c0_4] : memref<1x128xf32, #tpu.memory_space<vmem>>, vector<1x128xf32>
    %4 = vector.broadcast %3 : vector<1x128xf32> to vector<128x128xf32>
    %5 = arith.mulf %2, %4 : vector<128x128xf32>
    %c0_5 = arith.constant 0 : index
    %c0_6 = arith.constant 0 : index
    %6 = vector.load %arg4[%c0_5, %c0_6] : memref<1x128xf32, #tpu.memory_space<vmem>>, vector<1x128xf32>
    %7 = vector.broadcast %6 : vector<1x128xf32> to vector<128x128xf32>
    %8 = arith.addf %5, %7 : vector<128x128xf32>
    %cst_7 = arith.constant 0.000000e+00 : f32
    %9 = vector.broadcast %cst_7 : f32 to vector<128x128xf32>
    %10 = arith.maximumf %8, %9 : vector<128x128xf32>
    %c0_8 = arith.constant 0 : index
    %c0_9 = arith.constant 0 : index
    %11 = vector.load %arg5[%c0_8, %c0_9] : memref<128x128xf32, #tpu.memory_space<vmem>>, vector<128x128xf32>
    tpu.vector_store %arg5[%c0_8, %c0_9], %10 {strides = array<i32>} : memref<128x128xf32, #tpu.memory_space<vmem>>, vector<128x128xf32>,
    return
  }
  func.func @transform_0(%arg0: i32) -> (i32, i32) {
    %c0_i32 = arith.constant 0 : i32
    %c0_i32_0 = arith.constant 0 : i32
    return %arg0, %c0_i32 : i32, i32
  }
  func.func @transform_1(%arg0: i32) -> (i32, i32) {
    %c0_i32 = arith.constant 0 : i32
    %c0_i32_0 = arith.constant 0 : i32
    %c0_i32_1 = arith.constant 0 : i32
    return %c0_i32, %c0_i32_0 : i32, i32
  }
  func.func @transform_2(%arg0: i32) -> (i32, i32) {
    %c0_i32 = arith.constant 0 : i32
    %c0_i32_0 = arith.constant 0 : i32
    %c0_i32_1 = arith.constant 0 : i32
    return %c0_i32, %c0_i32_0 : i32, i32
  }
  func.func @transform_3(%arg0: i32) -> (i32, i32) {
    %c0_i32 = arith.constant 0 : i32
    %c0_i32_0 = arith.constant 0 : i32
    %c0_i32_1 = arith.constant 0 : i32
    return %c0_i32, %c0_i32_0 : i32, i32
  }
  func.func @transform_4(%arg0: i32) -> (i32, i32) {
    %c0_i32 = arith.constant 0 : i32
    %c0_i32_0 = arith.constant 0 : i32
    return %arg0, %c0_i32 : i32, i32
  }
}

module attributes {stable_mosaic.version = 11 : i64} {
  func.func @avgpool2_kernel(%arg0: i32, %arg1: memref<8x64xf32, #tpu.memory_space<vmem>>, %arg2: memref<8x64xf32, #tpu.memory_space<vmem>>, %arg3: memref<8x64xf32, #tpu.memory_space<vmem>>, %arg4: memref<8x64xf32, #tpu.memory_space<vmem>>, %arg5: memref<8x64xf32, #tpu.memory_space<vmem>>) attributes {dimension_semantics = [#tpu.dimension_semantics<parallel>], iteration_bounds = array<i64: 1>, scalar_prefetch = 0 : i64, scratch_operands = 0 : i64, tpu.core_type = #tpu.core_type<tc>, window_params = [{transform_indices = @transform_0, window_bounds = array<i64: 8, 64>}, {transform_indices = @transform_1, window_bounds = array<i64: 8, 64>}, {transform_indices = @transform_2, window_bounds = array<i64: 8, 64>}, {transform_indices = @transform_3, window_bounds = array<i64: 8, 64>}, {transform_indices = @transform_4, window_bounds = array<i64: 8, 64>}]} {
    %c0 = arith.constant 0 : index
    %c0_0 = arith.constant 0 : index
    %0 = vector.load %arg1[%c0, %c0_0] : memref<8x64xf32, #tpu.memory_space<vmem>>, vector<8x64xf32>
    %c0_1 = arith.constant 0 : index
    %c0_2 = arith.constant 0 : index
    %1 = vector.load %arg2[%c0_1, %c0_2] : memref<8x64xf32, #tpu.memory_space<vmem>>, vector<8x64xf32>
    %2 = arith.addf %0, %1 : vector<8x64xf32>
    %c0_3 = arith.constant 0 : index
    %c0_4 = arith.constant 0 : index
    %3 = vector.load %arg3[%c0_3, %c0_4] : memref<8x64xf32, #tpu.memory_space<vmem>>, vector<8x64xf32>
    %4 = arith.addf %2, %3 : vector<8x64xf32>
    %c0_5 = arith.constant 0 : index
    %c0_6 = arith.constant 0 : index
    %5 = vector.load %arg4[%c0_5, %c0_6] : memref<8x64xf32, #tpu.memory_space<vmem>>, vector<8x64xf32>
    %6 = arith.addf %4, %5 : vector<8x64xf32>
    %cst = arith.constant 2.500000e-01 : f32
    %7 = vector.broadcast %cst : f32 to vector<8x64xf32>
    %8 = arith.mulf %6, %7 : vector<8x64xf32>
    %c0_7 = arith.constant 0 : index
    %c0_8 = arith.constant 0 : index
    %9 = vector.load %arg5[%c0_7, %c0_8] : memref<8x64xf32, #tpu.memory_space<vmem>>, vector<8x64xf32>
    tpu.vector_store %arg5[%c0_7, %c0_8], %8 {strides = array<i32>} : memref<8x64xf32, #tpu.memory_space<vmem>>, vector<8x64xf32>,
    return
  }
  func.func @transform_0(%arg0: i32) -> (i32, i32) {
    %c0_i32 = arith.constant 0 : i32
    %c0_i32_0 = arith.constant 0 : i32
    return %arg0, %c0_i32 : i32, i32
  }
  func.func @transform_1(%arg0: i32) -> (i32, i32) {
    %c0_i32 = arith.constant 0 : i32
    %c0_i32_0 = arith.constant 0 : i32
    return %arg0, %c0_i32 : i32, i32
  }
  func.func @transform_2(%arg0: i32) -> (i32, i32) {
    %c0_i32 = arith.constant 0 : i32
    %c0_i32_0 = arith.constant 0 : i32
    return %arg0, %c0_i32 : i32, i32
  }
  func.func @transform_3(%arg0: i32) -> (i32, i32) {
    %c0_i32 = arith.constant 0 : i32
    %c0_i32_0 = arith.constant 0 : i32
    return %arg0, %c0_i32 : i32, i32
  }
  func.func @transform_4(%arg0: i32) -> (i32, i32) {
    %c0_i32 = arith.constant 0 : i32
    %c0_i32_0 = arith.constant 0 : i32
    return %arg0, %c0_i32 : i32, i32
  }
}

</mosaic_0001>

<bundles_post_ra>
// kernel: thermal_module_forward.4
= control target key start
LH: loop header
LB: loop body
LE: loop exit
PB: predicated region body
PF: predicated region fallthrough
CT: control target
= control target key end

     0   :  { %vm114_vm0 = vcmask 1044480   ;;  %vm115_vm1 = vcmask 1045504   ;;  %vm89_vm2 = vcmask 220160   ;;  %v365_v1 = vmov 65535   ;;  %s501_s1 = inlined_call_operand.vmem [shape: bf16[27,128], index: 1, kind: input, shape index: {}]   ;;  %s502_s0 = inlined_call_operand.vmem [shape: bf16[128,27], index: 0, kind: input, shape index: {}]   ;;  %s503_s2 = inlined_call_operand.vmem [shape: f32[1,128], index: 2, kind: input, shape index: {}]   ;;  %s504_s3 = inlined_call_operand.vmem [shape: f32[1,128], index: 3, kind: input, shape index: {}]   ;;  %s505_s4 = inlined_call_operand.vmem [shape: f32[128,128], index: 4, kind: output, shape index: {}]  }
   0x1   :  { %v355_v0 = vld [vmem:[%s501_s1] sm:$0xff]   ;;  %v116_v2 = vsel %vm114_vm0, 4294967295, %v365_v1  ;;  %v356_v3 = vld [vmem:[%s501_s1 + $0x8] sm:$0x3f]   ;;  %v361_v10 = vld [vmem:[%s502_s0 + $0x10] sm:$0xff]  }
   0x2   :  { %330 = vmatprep.subr.bf16.mxu0 %v355_v0  ;;  %350 = vmatprep.subr.bf16.mxu1 %v355_v0  ;;  %v117_v4 = vsel %vm115_vm1, %v116_v2, 0  ;;  %v357_v5 = vld [vmem:[%s502_s0] sm:$0xff]   ;;  %v359_v8 = vld [vmem:[%s502_s0 + $0x8] sm:$0xff]   ;;  %v362_v11 = vld [vmem:[%s502_s0 + $0x30] sm:$0xff]  }
   0x3   :  { %331 = vmatpush3.bf16.msra.mxu0 %v355_v0  ;;  %352 = vmatpush3.bf16.msra.mxu1 %v355_v0  ;;  %v119_v6 = vand.u32 %v356_v3, %v117_v4  ;;  %v358_v7 = vld [vmem:[%s502_s0 + $0x20] sm:$0xff]   ;;  %v360_v9 = vld [vmem:[%s502_s0 + $0x28] sm:$0xff]   ;;  %v363_v12 = vld [vmem:[%s502_s0 + $0x18] sm:$0xff]  }
   0x4   :  { %334 = vmatprep.mubr.msk.bf16.mxu0 %vm89_vm2, %v357_v5  ;;  %342 = vmatprep.mubr.msk.bf16.mxu1 %vm89_vm2, %v358_v7  ;;  %v364_v13 = vld [vmem:[%s502_s0 + $0x38] sm:$0xff]   ;;  %v318_v14 = vld [vmem:[%s503_s2] ss:$0 sm:$0xff] }
   0x5   :  { %332 = vmatprep.subr.bf16.mxu0 %v119_v6  ;;  %351 = vmatprep.subr.bf16.mxu1 %v119_v6  ;;  %v435_v16 = vld [vmem:[%s504_s3] ss:$0 sm:$0xff] }
   0x7   :  { %333 = vmatpush3.bf16.msra.mxu0 %v119_v6  ;;  %353 = vmatpush3.bf16.msra.mxu1 %v119_v6 }
   0xa   :  { %335 = vmatmul.mubr.msk.bf16.vlgmr.msra.gmra.mrb[0].mxu0 %vm89_vm2, %v359_v8  ;;  %343 = vmatmul.mubr.msk.bf16.vlgmr.msra.gmra.mrb[0].mxu1 %vm89_vm2, %v360_v9 }
   0xb   :  { %338 = vmatprep.mubr.msk.bf16.mxu0 %vm89_vm2, %v361_v10  ;;  %346 = vmatprep.mubr.msk.bf16.mxu1 %vm89_vm2, %v362_v11 }
  0x12   :  { %339 = vmatmul.mubr.msk.bf16.gmra.mrb[4].mxu0 %vm89_vm2, %v363_v12  ;;  %347 = vmatmul.mubr.msk.bf16.gmra.mrb[4].mxu1 %vm89_vm2, %v364_v13 }
  0xdd   :  { %v336_v15 = vpop.f32.mrb[0].mxu0  ;;  %v344_v17 = vpop.f32.mrb[0].mxu1 }
  0xde   :  { %v227_v18 = vmul.f32 %v336_v15, %v318_v14  ;;  %v235_v19 = vmul.f32 %v344_v17, %v318_v14  ;;  %v155_v20 = vpop.f32.mrb[1].mxu0  ;;  %v187_v21 = vpop.f32.mrb[1].mxu1 }
  0xdf   :  { %v225_v22 = vmul.f32 %v318_v14, %v155_v20  ;;  %v233_v23 = vmul.f32 %v318_v14, %v187_v21  ;;  %v337_v24 = vpop.f32.mrb[2].mxu0  ;;  %v345_v25 = vpop.f32.mrb[2].mxu1 }
  0xe0   :  { %v250_v26 = vadd.f32 %v435_v16, %v227_v18  ;;  %v258_v27 = vadd.f32 %v435_v16, %v235_v19  ;;  %v228_v28 = vmul.f32 %v337_v24, %v318_v14  ;;  %v236_v29 = vmul.f32 %v345_v25, %v318_v14  ;;  %v158_v30 = vpop.f32.mrb[3].mxu0  ;;  %v190_v31 = vpop.f32.mrb[3].mxu1 }
  0xe1   :  { %v248_v32 = vadd.f32 %v435_v16, %v225_v22  ;;  %v256_v33 = vadd.f32 %v435_v16, %v233_v23  ;;  %v226_v34 = vmul.f32 %v318_v14, %v158_v30  ;;  %v234_v35 = vmul.f32 %v318_v14, %v190_v31 }
  0xe2   :  { %v266_v36 = vmax.f32 %v250_v26, 0.0  ;;  %v274_v37 = vmax.f32 %v258_v27, 0.0  ;;  %v251_v38 = vadd.f32 %v435_v16, %v228_v28  ;;  %v259_v39 = vadd.f32 %v435_v16, %v236_v29 }
  0xe3   :  { %v264_v40 = vmax.f32 %v248_v32, 0.0  ;;  %v272_v41 = vmax.f32 %v256_v33, 0.0  ;;  %v249_v42 = vadd.f32 %v435_v16, %v226_v34  ;;  %v257_v43 = vadd.f32 %v435_v16, %v234_v35 }
  0xe4   :  { %282 = vst [vmem:[%s505_s4 + $0x10] sm:$0xff] %v266_v36  ;;  %290 = vst [vmem:[%s505_s4 + $0x50] sm:$0xff] %v274_v37  ;;  %v267_v44 = vmax.f32 %v251_v38, 0.0  ;;  %v275_v45 = vmax.f32 %v259_v39, 0.0 }
  0xe5   :  { %280 = vst [vmem:[%s505_s4] sm:$0xff] %v264_v40  ;;  %288 = vst [vmem:[%s505_s4 + $0x40] sm:$0xff] %v272_v41  ;;  %v265_v46 = vmax.f32 %v249_v42, 0.0  ;;  %v273_v47 = vmax.f32 %v257_v43, 0.0  ;;  %v340_v48 = vpop.f32.mrb[4].mxu0  ;;  %v348_v49 = vpop.f32.mrb[4].mxu1 }
  0xe6   :  { %283 = vst [vmem:[%s505_s4 + $0x18] sm:$0xff] %v267_v44  ;;  %291 = vst [vmem:[%s505_s4 + $0x58] sm:$0xff] %v275_v45  ;;  %v231_v50 = vmul.f32 %v340_v48, %v318_v14  ;;  %v239_v51 = vmul.f32 %v348_v49, %v318_v14  ;;  %v171_v52 = vpop.f32.mrb[5].mxu0  ;;  %v203_v53 = vpop.f32.mrb[5].mxu1 }
  0xe7   :  { %281 = vst [vmem:[%s505_s4 + $0x8] sm:$0xff] %v265_v46  ;;  %289 = vst [vmem:[%s505_s4 + $0x48] sm:$0xff] %v273_v47  ;;  %v229_v54 = vmul.f32 %v318_v14, %v171_v52  ;;  %v237_v55 = vmul.f32 %v318_v14, %v203_v53  ;;  %v341_v56 = vpop.f32.mrb[6].mxu0  ;;  %v349_v57 = vpop.f32.mrb[6].mxu1 }
  0xe8   :  { %v254_v58 = vadd.f32 %v435_v16, %v231_v50  ;;  %v262_v59 = vadd.f32 %v435_v16, %v239_v51  ;;  %v232_v60 = vmul.f32 %v341_v56, %v318_v14  ;;  %v240_v61 = vmul.f32 %v349_v57, %v318_v14  ;;  %v174_v62 = vpop.f32.mrb[7].mxu0  ;;  %v206_v63 = vpop.f32.mrb[7].mxu1 }
  0xe9   :  { %v252_v0 = vadd.f32 %v435_v16, %v229_v54  ;;  %v260_v1 = vadd.f32 %v435_v16, %v237_v55  ;;  %v230_v2 = vmul.f32 %v318_v14, %v174_v62  ;;  %v238_v3 = vmul.f32 %v318_v14, %v206_v63 }
  0xea   :  { %v270_v4 = vmax.f32 %v254_v58, 0.0  ;;  %v278_v5 = vmax.f32 %v262_v59, 0.0  ;;  %v255_v6 = vadd.f32 %v435_v16, %v232_v60  ;;  %v263_v7 = vadd.f32 %v435_v16, %v240_v61 }
  0xeb   :  { %v268_v8 = vmax.f32 %v252_v0, 0.0  ;;  %v276_v9 = vmax.f32 %v260_v1, 0.0  ;;  %v253_v10 = vadd.f32 %v435_v16, %v230_v2  ;;  %v261_v11 = vadd.f32 %v435_v16, %v238_v3 }
  0xec   :  { %286 = vst [vmem:[%s505_s4 + $0x30] sm:$0xff] %v270_v4  ;;  %294 = vst [vmem:[%s505_s4 + $0x70] sm:$0xff] %v278_v5  ;;  %v271_v12 = vmax.f32 %v255_v6, 0.0  ;;  %v279_v13 = vmax.f32 %v263_v7, 0.0 }
  0xed   :  { %284 = vst [vmem:[%s505_s4 + $0x20] sm:$0xff] %v268_v8  ;;  %292 = vst [vmem:[%s505_s4 + $0x60] sm:$0xff] %v276_v9  ;;  %v269_v14 = vmax.f32 %v253_v10, 0.0  ;;  %v277_v15 = vmax.f32 %v261_v11, 0.0 }
  0xee   :  { %287 = vst [vmem:[%s505_s4 + $0x38] sm:$0xff] %v271_v12  ;;  %295 = vst [vmem:[%s505_s4 + $0x78] sm:$0xff] %v279_v13 }
  0xef   :  { %285 = vst [vmem:[%s505_s4 + $0x28] sm:$0xff] %v269_v14  ;;  %293 = vst [vmem:[%s505_s4 + $0x68] sm:$0xff] %v277_v15 }

// kernel: thermal_module_forward.5
= control target key start
LH: loop header
LB: loop body
LE: loop exit
PB: predicated region body
PF: predicated region fallthrough
CT: control target
= control target key end

     0   :  { %vm110_vm0 = vcmask 588800   ;;  %vm135_vm1 = vcmask 1043456   ;;  %s549_s1 = inlined_call_operand.vmem [shape: bf16[72,128], index: 1, kind: input, shape index: {}]   ;;  %s550_s0 = inlined_call_operand.vmem [shape: bf16[128,72], index: 0, kind: input, shape index: {}]   ;;  %s551_s2 = inlined_call_operand.vmem [shape: f32[1,128], index: 2, kind: input, shape index: {}]   ;;  %s552_s3 = inlined_call_operand.vmem [shape: f32[1,128], index: 3, kind: input, shape index: {}]   ;;  %s553_s4 = inlined_call_operand.vmem [shape: f32[128,128], index: 4, kind: output, shape index: {}]  }
   0x1   :  { %v392_v0 = vld [vmem:[%s549_s1] sm:$0xff]   ;;  %v393_v1 = vld [vmem:[%s549_s1 + $0x8] sm:$0xff]   ;;  %v394_v2 = vld [vmem:[%s549_s1 + $0x10] sm:$0xff]  }
   0x2   :  { %354 = vmatprep.subr.bf16.mxu0 %v392_v0  ;;  %380 = vmatprep.subr.bf16.mxu1 %v392_v0  ;;  %v397_v3 = vld [vmem:[%s550_s0] sm:$0xff]   ;;  %v395_v5 = vld [vmem:[%s549_s1 + $0x18] sm:$0xff]   ;;  %v399_v8 = vld [vmem:[%s550_s0 + $0x8] sm:$0xff]  }
   0x3   :  { %355 = vmatpush3.bf16.msra.mxu0 %v392_v0  ;;  %385 = vmatpush3.bf16.msra.mxu1 %v392_v0  ;;  %v398_v4 = vld [vmem:[%s550_s0 + $0x20] sm:$0xff]   ;;  %v400_v9 = vld [vmem:[%s550_s0 + $0x28] sm:$0xff]   ;;  %v401_v10 = vld [vmem:[%s550_s0 + $0x10] sm:$0xff]  }
   0x4   :  { %356 = vmatprep.subr.bf16.mxu0 %v393_v1  ;;  %381 = vmatprep.subr.bf16.mxu1 %v393_v1  ;;  %v396_v6 = vld [vmem:[%s549_s1 + $0x20] ss:$0 sps:$4 sm:$0xff]   ;;  %v402_v11 = vld [vmem:[%s550_s0 + $0x30] sm:$0xff]   ;;  %v403_v12 = vld [vmem:[%s550_s0 + $0x18] sm:$0xff]  }
   0x5   :  { %364 = vmatprep.mubr.msk.bf16.mxu0 %vm110_vm0, %v397_v3  ;;  %372 = vmatprep.mubr.msk.bf16.mxu1 %vm110_vm0, %v398_v4  ;;  %v137_v7 = vsel %vm135_vm1, %v396_v6, 0  ;;  %v404_v13 = vld [vmem:[%s550_s0 + $0x38] sm:$0xff]   ;;  %v339_v14 = vld [vmem:[%s551_s2] ss:$0 sm:$0xff] }
   0x6   :  { %v483_v16 = vld [vmem:[%s552_s3] ss:$0 sm:$0xff] }
   0x7   :  { %357 = vmatpush3.bf16.msra.mxu0 %v393_v1  ;;  %386 = vmatpush3.bf16.msra.mxu1 %v393_v1 }
   0x8   :  { %358 = vmatprep.subr.bf16.mxu0 %v394_v2  ;;  %382 = vmatprep.subr.bf16.mxu1 %v394_v2 }
   0xb   :  { %359 = vmatpush3.bf16.msra.mxu0 %v394_v2  ;;  %387 = vmatpush3.bf16.msra.mxu1 %v394_v2 }
   0xc   :  { %360 = vmatprep.subr.bf16.mxu0 %v395_v5  ;;  %383 = vmatprep.subr.bf16.mxu1 %v395_v5 }
   0xf   :  { %361 = vmatpush3.bf16.msra.mxu0 %v395_v5  ;;  %388 = vmatpush3.bf16.msra.mxu1 %v395_v5 }
  0x10   :  { %390 = vmatprep.subr.msk.bf16.mxu0 %vm135_vm1, %v396_v6  ;;  %391 = vmatprep.subr.msk.bf16.mxu1 %vm135_vm1, %v396_v6 }
  0x13   :  { %363 = vmatpush3.bf16.msra.mxu0 %v137_v7  ;;  %389 = vmatpush3.bf16.msra.mxu1 %v137_v7 }
  0x16   :  { %365 = vmatmul.mubr.msk.bf16.vlgmr.msra.gmra.mrb[0].mxu0 %vm110_vm0, %v399_v8  ;;  %373 = vmatmul.mubr.msk.bf16.vlgmr.msra.gmra.mrb[0].mxu1 %vm110_vm0, %v400_v9 }
  0x17   :  { %368 = vmatprep.mubr.msk.bf16.mxu0 %vm110_vm0, %v401_v10  ;;  %376 = vmatprep.mubr.msk.bf16.mxu1 %vm110_vm0, %v402_v11 }
  0x1e   :  { %369 = vmatmul.mubr.msk.bf16.gmra.mrb[4].mxu0 %vm110_vm0, %v403_v12  ;;  %377 = vmatmul.mubr.msk.bf16.gmra.mrb[4].mxu1 %vm110_vm0, %v404_v13 }
  0xe9   :  { %v366_v15 = vpop.f32.mrb[0].mxu0  ;;  %v374_v17 = vpop.f32.mrb[0].mxu1 }
  0xea   :  { %v245_v18 = vmul.f32 %v366_v15, %v339_v14  ;;  %v253_v19 = vmul.f32 %v374_v17, %v339_v14  ;;  %v173_v20 = vpop.f32.mrb[1].mxu0  ;;  %v205_v21 = vpop.f32.mrb[1].mxu1 }
  0xeb   :  { %v243_v22 = vmul.f32 %v339_v14, %v173_v20  ;;  %v251_v23 = vmul.f32 %v339_v14, %v205_v21  ;;  %v367_v24 = vpop.f32.mrb[2].mxu0  ;;  %v375_v25 = vpop.f32.mrb[2].mxu1 }
  0xec   :  { %v268_v26 = vadd.f32 %v483_v16, %v245_v18  ;;  %v276_v27 = vadd.f32 %v483_v16, %v253_v19  ;;  %v246_v28 = vmul.f32 %v367_v24, %v339_v14  ;;  %v254_v29 = vmul.f32 %v375_v25, %v339_v14  ;;  %v176_v30 = vpop.f32.mrb[3].mxu0  ;;  %v208_v31 = vpop.f32.mrb[3].mxu1 }
  0xed   :  { %v266_v32 = vadd.f32 %v483_v16, %v243_v22  ;;  %v274_v33 = vadd.f32 %v483_v16, %v251_v23  ;;  %v244_v34 = vmul.f32 %v339_v14, %v176_v30  ;;  %v252_v35 = vmul.f32 %v339_v14, %v208_v31 }
  0xee   :  { %v284_v36 = vmax.f32 %v268_v26, 0.0  ;;  %v292_v37 = vmax.f32 %v276_v27, 0.0  ;;  %v269_v38 = vadd.f32 %v483_v16, %v246_v28  ;;  %v277_v39 = vadd.f32 %v483_v16, %v254_v29 }
  0xef   :  { %v282_v40 = vmax.f32 %v266_v32, 0.0  ;;  %v290_v41 = vmax.f32 %v274_v33, 0.0  ;;  %v267_v42 = vadd.f32 %v483_v16, %v244_v34  ;;  %v275_v43 = vadd.f32 %v483_v16, %v252_v35 }
  0xf0   :  { %300 = vst [vmem:[%s553_s4 + $0x10] sm:$0xff] %v284_v36  ;;  %308 = vst [vmem:[%s553_s4 + $0x50] sm:$0xff] %v292_v37  ;;  %v285_v44 = vmax.f32 %v269_v38, 0.0  ;;  %v293_v45 = vmax.f32 %v277_v39, 0.0 }
  0xf1   :  { %298 = vst [vmem:[%s553_s4] sm:$0xff] %v282_v40  ;;  %306 = vst [vmem:[%s553_s4 + $0x40] sm:$0xff] %v290_v41  ;;  %v283_v46 = vmax.f32 %v267_v42, 0.0  ;;  %v291_v47 = vmax.f32 %v275_v43, 0.0  ;;  %v370_v48 = vpop.f32.mrb[4].mxu0  ;;  %v378_v49 = vpop.f32.mrb[4].mxu1 }
  0xf2   :  { %301 = vst [vmem:[%s553_s4 + $0x18] sm:$0xff] %v285_v44  ;;  %309 = vst [vmem:[%s553_s4 + $0x58] sm:$0xff] %v293_v45  ;;  %v249_v50 = vmul.f32 %v370_v48, %v339_v14  ;;  %v257_v51 = vmul.f32 %v378_v49, %v339_v14  ;;  %v189_v52 = vpop.f32.mrb[5].mxu0  ;;  %v221_v53 = vpop.f32.mrb[5].mxu1 }
  0xf3   :  { %299 = vst [vmem:[%s553_s4 + $0x8] sm:$0xff] %v283_v46  ;;  %307 = vst [vmem:[%s553_s4 + $0x48] sm:$0xff] %v291_v47  ;;  %v247_v54 = vmul.f32 %v339_v14, %v189_v52  ;;  %v255_v55 = vmul.f32 %v339_v14, %v221_v53  ;;  %v371_v56 = vpop.f32.mrb[6].mxu0  ;;  %v379_v57 = vpop.f32.mrb[6].mxu1 }
  0xf4   :  { %v272_v58 = vadd.f32 %v483_v16, %v249_v50  ;;  %v280_v59 = vadd.f32 %v483_v16, %v257_v51  ;;  %v250_v60 = vmul.f32 %v371_v56, %v339_v14  ;;  %v258_v61 = vmul.f32 %v379_v57, %v339_v14  ;;  %v192_v62 = vpop.f32.mrb[7].mxu0  ;;  %v224_v63 = vpop.f32.mrb[7].mxu1 }
  0xf5   :  { %v270_v0 = vadd.f32 %v483_v16, %v247_v54  ;;  %v278_v1 = vadd.f32 %v483_v16, %v255_v55  ;;  %v248_v2 = vmul.f32 %v339_v14, %v192_v62  ;;  %v256_v3 = vmul.f32 %v339_v14, %v224_v63 }
  0xf6   :  { %v288_v4 = vmax.f32 %v272_v58, 0.0  ;;  %v296_v5 = vmax.f32 %v280_v59, 0.0  ;;  %v273_v6 = vadd.f32 %v483_v16, %v250_v60  ;;  %v281_v7 = vadd.f32 %v483_v16, %v258_v61 }
  0xf7   :  { %v286_v8 = vmax.f32 %v270_v0, 0.0  ;;  %v294_v9 = vmax.f32 %v278_v1, 0.0  ;;  %v271_v10 = vadd.f32 %v483_v16, %v248_v2  ;;  %v279_v11 = vadd.f32 %v483_v16, %v256_v3 }
  0xf8   :  { %304 = vst [vmem:[%s553_s4 + $0x30] sm:$0xff] %v288_v4  ;;  %312 = vst [vmem:[%s553_s4 + $0x70] sm:$0xff] %v296_v5  ;;  %v289_v12 = vmax.f32 %v273_v6, 0.0  ;;  %v297_v13 = vmax.f32 %v281_v7, 0.0 }
  0xf9   :  { %302 = vst [vmem:[%s553_s4 + $0x20] sm:$0xff] %v286_v8  ;;  %310 = vst [vmem:[%s553_s4 + $0x60] sm:$0xff] %v294_v9  ;;  %v287_v14 = vmax.f32 %v271_v10, 0.0  ;;  %v295_v15 = vmax.f32 %v279_v11, 0.0 }
  0xfa   :  { %305 = vst [vmem:[%s553_s4 + $0x38] sm:$0xff] %v289_v12  ;;  %313 = vst [vmem:[%s553_s4 + $0x78] sm:$0xff] %v297_v13 }
  0xfb   :  { %303 = vst [vmem:[%s553_s4 + $0x28] sm:$0xff] %v287_v14  ;;  %311 = vst [vmem:[%s553_s4 + $0x68] sm:$0xff] %v295_v15 }

// kernel: thermal_module_forward.7
= control target key start
LH: loop header
LB: loop body
LE: loop exit
PB: predicated region body
PF: predicated region fallthrough
CT: control target
= control target key end

     0   :  { %vm25_vm0 = vcmask 523264   ;;  %s71_s0 = inlined_call_operand.vmem [shape: f32[8,64], index: 0, kind: input, shape index: {}]   ;;  %s72_s1 = inlined_call_operand.vmem [shape: f32[8,64], index: 1, kind: input, shape index: {}]   ;;  %s73_s2 = inlined_call_operand.vmem [shape: f32[8,64], index: 2, kind: input, shape index: {}]   ;;  %s74_s3 = inlined_call_operand.vmem [shape: f32[8,64], index: 3, kind: input, shape index: {}]   ;;  %s75_s4 = inlined_call_operand.vmem [shape: f32[8,64], index: 4, kind: output, shape index: {}]  }
   0x1   :  { %v17_v0 = vld [vmem:[%s71_s0] sm:$0xff] }
   0x2   :  { %v18_v1 = vld [vmem:[%s72_s1] sm:$0xff] }
   0x3   :  { %v20_v2 = vld [vmem:[%s73_s2] sm:$0xff]  ;;  %v19_v3 = vadd.f32 %v18_v1, %v17_v0 }
   0x4   :  { %v22_v4 = vld [vmem:[%s74_s3] sm:$0xff] }
   0x5   :  { %v21_v5 = vadd.f32 %v20_v2, %v19_v3 }
   0x7   :  { %v23_v6 = vadd.f32 %v22_v4, %v21_v5 }
   0x9   :  { %v24_v7 = vmul.f32 0.25, %v23_v6 }
   0xb   :  { %26 = vst.msk [vmem:[%s75_s4] sm:$0xff] %vm25_vm0, %v24_v7 }

</bundles_post_ra>
